<compile_context>
chip_gen: v6e
topology: v6e:2x2x1
jax: 0.10.0
libtpu: 0.0.40
codegen_flags: <defaults>
</compile_context>

<pallas_src>
import jax
import jax.numpy as jnp
import numpy as np
from jax.experimental import pallas as pl
from jax.experimental.pallas import tpu as pltpu


def _make_temporal_block_kernel(K, dilation, L, Cin, Cout, nbl, has_downsample,
                                out_dtype):
    def kernel(xcol_ref, w1_ref, b1_ref, w2_ref, b2_ref, *rest):
        if has_downsample:
            wd_ref, bd_ref, o_ref = rest
        else:
            (o_ref,) = rest

        xcol = xcol_ref[...]                           # (K*Cin, nbl)

        # ---- conv1 (+ chomp) as one MXU push, then ReLU ----
        h1 = jnp.dot(w1_ref[...], xcol, preferred_element_type=jnp.float32)
        h1 = jnp.maximum(h1 + b1_ref[...], 0.0)        # (Cout, nbl) f32
        # dropout1: identity (inference semantics)
        # TODO(synk): training-mode stochastic dropout not implemented.

        # ---- conv2: build causally shifted operand stack on values ----
        # Batches are folded into the lane axis, so a global lane shift leaks
        # across batch boundaries; mask lanes with t (time within sequence) < s.
        t_idx = jax.lax.broadcasted_iota(jnp.int32, (Cout, nbl), 1)
        if L & (L - 1) == 0:
            t_idx = jnp.bitwise_and(t_idx, L - 1)
        else:
            t_idx = jax.lax.rem(t_idx, L)

        cols = []
        for k in range(K):
            s = (K - 1 - k) * dilation                 # causal right-shift for tap k
            if s == 0:
                cols.append(h1)
            else:
                shifted = jnp.concatenate(
                    [jnp.zeros((Cout, s), jnp.float32), h1[:, :nbl - s]], axis=1)
                cols.append(jnp.where(t_idx >= s, shifted, 0.0))
        h1col = jnp.concatenate(cols, axis=0).astype(w2_ref.dtype)  # (K*Cout, nbl)

        h2 = jnp.dot(w2_ref[...], h1col, preferred_element_type=jnp.float32)
        h2 = jnp.maximum(h2 + b2_ref[...], 0.0)
        # dropout2: identity (inference semantics)

        # ---- residual branch: x is the zero-shift tap of xcol (no extra DMA) ----
        x_res = xcol[(K - 1) * Cin:, :]                # (Cin, nbl)
        if has_downsample:
            res = jnp.dot(wd_ref[...], x_res, preferred_element_type=jnp.float32)
            res = res + bd_ref[...]
        else:
            res = x_res.astype(jnp.float32)            # identity residual, no matmul

        o_ref[...] = jnp.maximum(h2 + res, 0.0).astype(out_dtype)

    return kernel


def _batches_per_step(B, L):
    """Whole batch per step for small problems; otherwise chunk the batch so the
    folded lane width stays a multiple of 128 (block-shape legality + density)."""
    if B * L <= 2048:
        return B
    for nb in range(B - 1, 0, -1):
        if B % nb == 0 and (nb * L) % 128 == 0 and nb * L <= 2048:
            return nb
    return B


def temporal_block_forward(x, params, *, kernel_size, dilation, padding,
                           compute_dtype=None):
    B, Cin, L = x.shape
    w1, b1, w2, b2, wd, bd = params
    Cout = w1.shape[0]
    K = kernel_size
    pad = padding
    assert pad == (K - 1) * dilation, "standard causal TCN padding expected"

    # On v6e/v7x pass compute_dtype=jnp.bfloat16 for native-rate MXU + half the
    # activation DMA bytes; accumulation stays f32 via preferred_element_type.
    cdt = compute_dtype if compute_dtype is not None else x.dtype

    # chomp(conv(pad both sides)) == causal conv with left-only padding
    xpad = jnp.pad(x, ((0, 0), (0, 0), (pad, 0)))              # (B, Cin, L+pad)
    # im2col: xcol[k*Cin + c, b*L + t] = xpad[b, c, t + k*dilation]
    taps = [xpad[:, :, k * dilation:k * dilation + L] for k in range(K)]
    xcol = jnp.stack(taps, axis=1).transpose(1, 2, 0, 3).reshape(K * Cin, B * L)
    xcol = xcol.astype(cdt)

    # stack per-tap weights: w1s[:, k*Cin + c] = w1[:, c, k]
    w1s = jnp.transpose(w1, (0, 2, 1)).reshape(Cout, K * Cin).astype(cdt)
    w2s = jnp.transpose(w2, (0, 2, 1)).reshape(Cout, K * Cout).astype(cdt)
    b1c = b1.reshape(Cout, 1).astype(jnp.float32)
    b2c = b2.reshape(Cout, 1).astype(jnp.float32)

    has_ds = wd is not None
    inputs = [xcol, w1s, b1c, w2s, b2c]
    nb = _batches_per_step(B, L)
    nbl = nb * L
    in_specs = [
        pl.BlockSpec((K * Cin, nbl), lambda i: (0, i)),
        pl.BlockSpec((Cout, K * Cin), lambda i: (0, 0)),
        pl.BlockSpec((Cout, 1), lambda i: (0, 0)),
        pl.BlockSpec((Cout, K * Cout), lambda i: (0, 0)),
        pl.BlockSpec((Cout, 1), lambda i: (0, 0)),
    ]
    if has_ds:
        inputs += [wd.reshape(Cout, Cin).astype(cdt),
                   bd.reshape(Cout, 1).astype(jnp.float32)]
        in_specs += [pl.BlockSpec((Cout, Cin), lambda i: (0, 0)),
                     pl.BlockSpec((Cout, 1), lambda i: (0, 0))]

    kernel = _make_temporal_block_kernel(K, dilation, L, Cin, Cout, nbl,
                                         has_ds, x.dtype)

    out_flat = pl.pallas_call(
        kernel,
        out_shape=jax.ShapeDtypeStruct((Cout, B * L), x.dtype),
        grid_spec=pltpu.PrefetchScalarGridSpec(
            num_scalar_prefetch=0,
            grid=(B // nb,),
            in_specs=in_specs,
            out_specs=pl.BlockSpec((Cout, nbl), lambda i: (0, i)),
        ),
        compiler_params=pltpu.CompilerParams(
            dimension_semantics=("parallel",)),   # batch chunks are independent
    )(*inputs)

    # layout plumbing back to PyTorch's NCL
    return out_flat.reshape(Cout, B, L).transpose(1, 0, 2)


def _apply_weight_norm(v, g):
    # PyTorch weight_norm(dim=0): w = g * v / ||v||, norm over all dims but 0.
    norm = jnp.sqrt(jnp.sum(v * v, axis=tuple(range(1, v.ndim)), keepdims=True))
    return g * v / norm


def _reference(x, w1, b1, w2, b2, wd, bd, pad, dil):
    def conv1d(xx, w, b, p, d):
        y = jax.lax.conv_general_dilated(
            xx, w, window_strides=(1,), padding=[(p, p)],
            rhs_dilation=(d,), dimension_numbers=("NCH", "OIH", "NCH"))
        return y + b[None, :, None]

    h = jax.nn.relu(conv1d(x, w1, b1, pad, dil)[:, :, :-pad])
    h = jax.nn.relu(conv1d(h, w2, b2, pad, dil)[:, :, :-pad])
    res = x if wd is None else conv1d(x, wd, bd, 0, 1)
    return jax.nn.relu(h + res)


if __name__ == "__main__":
    K, stride, dilation = 3, 1, 2
    padding = (K - 1) * dilation  # standard TCN causal padding

    key = jax.random.PRNGKey(0)
    ks = jax.random.split(key, 9)

    # ---------------- case 1: downsample path (Cin != Cout) ----------------
    B, Cin, Cout, L = 8, 4, 8, 16          # B*L = 128 -> lane-dense
    v1 = 0.01 * jax.random.normal(ks[0], (Cout, Cin, K), jnp.float32)
    g1 = 0.5 + jnp.abs(0.1 * jax.random.normal(ks[1], (Cout, 1, 1), jnp.float32))
    b1 = 0.1 * jax.random.normal(ks[2], (Cout,), jnp.float32)
    v2 = 0.01 * jax.random.normal(ks[3], (Cout, Cout, K), jnp.float32)
    g2 = 0.5 + jnp.abs(0.1 * jax.random.normal(ks[4], (Cout, 1, 1), jnp.float32))
    b2 = 0.1 * jax.random.normal(ks[5], (Cout,), jnp.float32)
    wd = 0.01 * jax.random.normal(ks[6], (Cout, Cin, 1), jnp.float32)
    bd = 0.1 * jax.random.normal(ks[7], (Cout,), jnp.float32)
    x = jax.random.normal(jax.random.PRNGKey(42), (B, Cin, L), jnp.float32)

    w1 = _apply_weight_norm(v1, g1)
    w2 = _apply_weight_norm(v2, g2)

    out = temporal_block_forward(
        x, (w1, b1, w2, b2, wd, bd),
        kernel_size=K, dilation=dilation, padding=padding)
    out = jax.block_until_ready(out)
    ref = _reference(x, w1, b1, w2, b2, wd, bd, padding, dilation)
    assert out.shape == (B, Cout, L)
    assert np.allclose(np.asarray(out), np.asarray(ref), atol=1e-4, rtol=1e-4)

    # ---------------- case 2: identity residual (Cin == Cout) ----------------
    Ci = 8
    v1b = 0.01 * jax.random.normal(ks[8], (Ci, Ci, K), jnp.float32)
    w1b = _apply_weight_norm(v1b, g1)
    xb = jax.random.normal(jax.random.PRNGKey(7), (B, Ci, L), jnp.float32)

    outb = temporal_block_forward(
        xb, (w1b, b1, w2, b2, None, None),
        kernel_size=K, dilation=dilation, padding=padding)
    outb = jax.block_until_ready(outb)
    refb = _reference(xb, w1b, b1, w2, b2, None, None, padding, dilation)
    assert outb.shape == (B, Ci, L)
    assert np.allclose(np.asarray(outb), np.asarray(refb), atol=1e-4, rtol=1e-4)

    print("KERNEL_OK")
</pallas_src>

<mosaic_0001>
module attributes {stable_mosaic.version = 11 : i64} {
  func.func @kernel(%arg0: i32, %arg1: memref<12x128xf32, #tpu.memory_space<vmem>>, %arg2: memref<8x12xf32, #tpu.memory_space<vmem>>, %arg3: memref<8x1xf32, #tpu.memory_space<vmem>>, %arg4: memref<8x24xf32, #tpu.memory_space<vmem>>, %arg5: memref<8x1xf32, #tpu.memory_space<vmem>>, %arg6: memref<8x4xf32, #tpu.memory_space<vmem>>, %arg7: memref<8x1xf32, #tpu.memory_space<vmem>>, %arg8: memref<8x128xf32, #tpu.memory_space<vmem>>) attributes {dimension_semantics = [#tpu.dimension_semantics<parallel>], iteration_bounds = array<i64: 1>, scalar_prefetch = 0 : i64, scratch_operands = 0 : i64, tpu.core_type = #tpu.core_type<tc>, window_params = [{transform_indices = @transform_0, window_bounds = array<i64: 12, 128>}, {pipeline_mode = #tpu.pipeline_mode<synchronous>, transform_indices = @transform_1, window_bounds = array<i64: 8, 12>}, {pipeline_mode = #tpu.pipeline_mode<synchronous>, transform_indices = @transform_2, window_bounds = array<i64: 8, 1>}, {pipeline_mode = #tpu.pipeline_mode<synchronous>, transform_indices = @transform_3, window_bounds = array<i64: 8, 24>}, {pipeline_mode = #tpu.pipeline_mode<synchronous>, transform_indices = @transform_4, window_bounds = array<i64: 8, 1>}, {pipeline_mode = #tpu.pipeline_mode<synchronous>, transform_indices = @transform_5, window_bounds = array<i64: 8, 4>}, {pipeline_mode = #tpu.pipeline_mode<synchronous>, transform_indices = @transform_6, window_bounds = array<i64: 8, 1>}, {transform_indices = @transform_7, window_bounds = array<i64: 8, 128>}]} {
    %c0 = arith.constant 0 : index
    %c0_0 = arith.constant 0 : index
    %0 = vector.load %arg1[%c0, %c0_0] : memref<12x128xf32, #tpu.memory_space<vmem>>, vector<12x128xf32>
    %c0_1 = arith.constant 0 : index
    %c0_2 = arith.constant 0 : index
    %1 = vector.load %arg2[%c0_1, %c0_2] : memref<8x12xf32, #tpu.memory_space<vmem>>, vector<8x12xf32>
    %cst = arith.constant dense<0.000000e+00> : vector<8x128xf32>
    %2 = tpu.matmul %1, %0, %cst {dimension_numbers = #tpu.dot_dimension_numbers<[1], [0], [0], [1], [0, 0, 1, 1], [], []>} : vector<8x12xf32>, vector<12x128xf32>, vector<8x128xf32> -> vector<8x128xf32>
    %c0_3 = arith.constant 0 : index
    %c0_4 = arith.constant 0 : index
    %3 = vector.load %arg3[%c0_3, %c0_4] : memref<8x1xf32, #tpu.memory_space<vmem>>, vector<8x1xf32>
    %4 = vector.broadcast %3 : vector<8x1xf32> to vector<8x128xf32>
    %5 = arith.addf %2, %4 : vector<8x128xf32>
    %cst_5 = arith.constant 0.000000e+00 : f32
    %6 = vector.broadcast %cst_5 : f32 to vector<8x128xf32>
    %7 = arith.maximumf %5, %6 : vector<8x128xf32>
    %8 = tpu.iota {dimensions = array<i32: 1>} : vector<8x128xi32>
    %c15_i32 = arith.constant 15 : i32
    %9 = vector.broadcast %c15_i32 : i32 to vector<8x128xi32>
    %10 = arith.andi %8, %9 : vector<8x128xi32>
    %cst_6 = arith.constant 0.000000e+00 : f32
    %11 = vector.broadcast %cst_6 : f32 to vector<8x4xf32>
    %12 = vector.extract_strided_slice %7 {offsets = [0, 0], sizes = [8, 124], strides = [1, 1]} : vector<8x128xf32> to vector<8x124xf32>
    %13 = tpu.concatenate %11, %12 in 1 : vector<8x4xf32>, vector<8x124xf32> -> vector<8x128xf32>
    %c4_i32 = arith.constant 4 : i32
    %14 = vector.broadcast %c4_i32 : i32 to vector<8x128xi32>
    %15 = arith.cmpi sge, %10, %14 : vector<8x128xi32>
    %cst_7 = arith.constant 0.000000e+00 : f32
    %16 = vector.broadcast %cst_7 : f32 to vector<8x128xf32>
    %17 = arith.select %15, %13, %16 : vector<8x128xi1>, vector<8x128xf32>
    %cst_8 = arith.constant 0.000000e+00 : f32
    %18 = vector.broadcast %cst_8 : f32 to vector<8x2xf32>
    %19 = vector.extract_strided_slice %7 {offsets = [0, 0], sizes = [8, 126], strides = [1, 1]} : vector<8x128xf32> to vector<8x126xf32>
    %20 = tpu.concatenate %18, %19 in 1 : vector<8x2xf32>, vector<8x126xf32> -> vector<8x128xf32>
    %c2_i32 = arith.constant 2 : i32
    %21 = vector.broadcast %c2_i32 : i32 to vector<8x128xi32>
    %22 = arith.cmpi sge, %10, %21 : vector<8x128xi32>
    %cst_9 = arith.constant 0.000000e+00 : f32
    %23 = vector.broadcast %cst_9 : f32 to vector<8x128xf32>
    %24 = arith.select %22, %20, %23 : vector<8x128xi1>, vector<8x128xf32>
    %25 = tpu.concatenate %17, %24, %7 in 0 : vector<8x128xf32>, vector<8x128xf32>, vector<8x128xf32> -> vector<24x128xf32>
    %c0_10 = arith.constant 0 : index
    %c0_11 = arith.constant 0 : index
    %26 = vector.load %arg4[%c0_10, %c0_11] : memref<8x24xf32, #tpu.memory_space<vmem>>, vector<8x24xf32>
    %cst_12 = arith.constant dense<0.000000e+00> : vector<8x128xf32>
    %27 = tpu.matmul %26, %25, %cst_12 {dimension_numbers = #tpu.dot_dimension_numbers<[1], [0], [0], [1], [0, 0, 1, 1], [], []>} : vector<8x24xf32>, vector<24x128xf32>, vector<8x128xf32> -> vector<8x128xf32>
    %c0_13 = arith.constant 0 : index
    %c0_14 = arith.constant 0 : index
    %28 = vector.load %arg5[%c0_13, %c0_14] : memref<8x1xf32, #tpu.memory_space<vmem>>, vector<8x1xf32>
    %29 = vector.broadcast %28 : vector<8x1xf32> to vector<8x128xf32>
    %30 = arith.addf %27, %29 : vector<8x128xf32>
    %cst_15 = arith.constant 0.000000e+00 : f32
    %31 = vector.broadcast %cst_15 : f32 to vector<8x128xf32>
    %32 = arith.maximumf %30, %31 : vector<8x128xf32>
    %33 = vector.extract_strided_slice %0 {offsets = [8, 0], sizes = [4, 128], strides = [1, 1]} : vector<12x128xf32> to vector<4x128xf32>
    %c0_16 = arith.constant 0 : index
    %c0_17 = arith.constant 0 : index
    %34 = vector.load %arg6[%c0_16, %c0_17] : memref<8x4xf32, #tpu.memory_space<vmem>>, vector<8x4xf32>
    %cst_18 = arith.constant dense<0.000000e+00> : vector<8x128xf32>
    %35 = tpu.matmul %34, %33, %cst_18 {dimension_numbers = #tpu.dot_dimension_numbers<[1], [0], [0], [1], [0, 0, 1, 1], [], []>} : vector<8x4xf32>, vector<4x128xf32>, vector<8x128xf32> -> vector<8x128xf32>
    %c0_19 = arith.constant 0 : index
    %c0_20 = arith.constant 0 : index
    %36 = vector.load %arg7[%c0_19, %c0_20] : memref<8x1xf32, #tpu.memory_space<vmem>>, vector<8x1xf32>
    %37 = vector.broadcast %36 : vector<8x1xf32> to vector<8x128xf32>
    %38 = arith.addf %35, %37 : vector<8x128xf32>
    %39 = arith.addf %32, %38 : vector<8x128xf32>
    %cst_21 = arith.constant 0.000000e+00 : f32
    %40 = vector.broadcast %cst_21 : f32 to vector<8x128xf32>
    %41 = arith.maximumf %39, %40 : vector<8x128xf32>
    %c0_22 = arith.constant 0 : index
    %c0_23 = arith.constant 0 : index
    %42 = vector.load %arg8[%c0_22, %c0_23] : memref<8x128xf32, #tpu.memory_space<vmem>>, vector<8x128xf32>
    tpu.vector_store %arg8[%c0_22, %c0_23], %41 {strides = array<i32>} : memref<8x128xf32, #tpu.memory_space<vmem>>, vector<8x128xf32>,
    return
  }
  func.func @transform_0(%arg0: i32) -> (i32, i32) {
    %c0_i32 = arith.constant 0 : i32
    %c0_i32_0 = arith.constant 0 : i32
    return %c0_i32, %arg0 : i32, i32
  }
  func.func @transform_1(%arg0: i32) -> (i32, i32) {
    %c0_i32 = arith.constant 0 : i32
    %c0_i32_0 = arith.constant 0 : i32
    %c0_i32_1 = arith.constant 0 : i32
    return %c0_i32, %c0_i32_0 : i32, i32
  }
  func.func @transform_2(%arg0: i32) -> (i32, i32) {
    %c0_i32 = arith.constant 0 : i32
    %c0_i32_0 = arith.constant 0 : i32
    %c0_i32_1 = arith.constant 0 : i32
    return %c0_i32, %c0_i32_0 : i32, i32
  }
  func.func @transform_3(%arg0: i32) -> (i32, i32) {
    %c0_i32 = arith.constant 0 : i32
    %c0_i32_0 = arith.constant 0 : i32
    %c0_i32_1 = arith.constant 0 : i32
    return %c0_i32, %c0_i32_0 : i32, i32
  }
  func.func @transform_4(%arg0: i32) -> (i32, i32) {
    %c0_i32 = arith.constant 0 : i32
    %c0_i32_0 = arith.constant 0 : i32
    %c0_i32_1 = arith.constant 0 : i32
    return %c0_i32, %c0_i32_0 : i32, i32
  }
  func.func @transform_5(%arg0: i32) -> (i32, i32) {
    %c0_i32 = arith.constant 0 : i32
    %c0_i32_0 = arith.constant 0 : i32
    %c0_i32_1 = arith.constant 0 : i32
    return %c0_i32, %c0_i32_0 : i32, i32
  }
  func.func @transform_6(%arg0: i32) -> (i32, i32) {
    %c0_i32 = arith.constant 0 : i32
    %c0_i32_0 = arith.constant 0 : i32
    %c0_i32_1 = arith.constant 0 : i32
    return %c0_i32, %c0_i32_0 : i32, i32
  }
  func.func @transform_7(%arg0: i32) -> (i32, i32) {
    %c0_i32 = arith.constant 0 : i32
    %c0_i32_0 = arith.constant 0 : i32
    return %c0_i32, %arg0 : i32, i32
  }
}

</mosaic_0001>

<bundles_post_ra>
// kernel: tpu_custom_call.1
= control target key start
LH: loop header
LB: loop body
LE: loop exit
PB: predicated region body
PF: predicated region fallthrough
CT: control target
= control target key end

     0   :  { %vm40_vm0 = vcmask 1043456   ;;  %v379_v1 = vmov 0.0   ;;  %vm380_vm1 = vmmov 0   ;;  %vm36_vm2 = vcmask 97280   ;;  %s459_s0 = inlined_call_operand.vmem [shape: f32[12,128], index: 0, kind: input, shape index: {}]   ;;  %s460_s1 = inlined_call_operand.vmem [shape: f32[8,12], index: 1, kind: input, shape index: {}]   ;;  %s461_s2 = inlined_call_operand.vmem [shape: f32[8,1], index: 2, kind: input, shape index: {}]   ;;  %s462_s3 = inlined_call_operand.vmem [shape: f32[8,24], index: 3, kind: input, shape index: {}]   ;;  %s463_s4 = inlined_call_operand.vmem [shape: f32[8,1], index: 4, kind: input, shape index: {}]   ;;  %s464_s5 = inlined_call_operand.vmem [shape: f32[8,4], index: 5, kind: input, shape index: {}]   ;;  %s465_s6 = inlined_call_operand.vmem [shape: f32[8,1], index: 6, kind: input, shape index: {}]   ;;  %s466_s7 = inlined_call_operand.hbm [shape: f32[8,128], index: 7, kind: output, shape index: {}]  }
   0x1   :  { %v28_v0 = vld [vmem:[%s459_s0 + $0x8] sm:$0xf]  ;;  %328 = vmatprep.subr.mxu0 %v379_v1  ;;  %v27_v2 = vld [vmem:[%s459_s0] sm:$0xff]  ;;  %332 = vmatprep.mubr.msk.f32.mxu0 %vm380_vm1, %v379_v1  ;;  %v381_v5 = vmov 0  }
   0x2   :  { %v30_v3 = vld [vmem:[%s461_s2] sm:$0xff]  ;;  %329 = vmatpush3.msk.msra.mxu0 %vm40_vm0, %v28_v0  ;;  %355 = vset.pattern.permute.xlu0 %v381_v5 }
   0x3   :  { %v29_v4 = vld [vmem:[%s460_s1] sm:$0xff] }
   0x4   :  { %12 = vsyncpa [#allocation3], 0  ;;  %330 = vmatprep.subr.mxu0 %v379_v1  ;;  %33 = vperm.xlu0 %355, %v30_v3   ;;  %vm122_vm3 = vcmask 31744   ;;  %v215_v6 = vld [vmem:[%s464_s5] sm:$0xff]  ;;  %s382_s1 = smov 4   ;;  %s383_s9 = smov 2   ;;  %v115_v16 = vlaneseq }
   0x5   :  { %331 = vmatpush3.msra.mxu0 %v27_v2  ;;  %335 = vmatprep.subr.mxu1 %v379_v1  ;;  %v216_v13 = vld [vmem:[%s465_s6] sm:$0xff]  ;;  %vm129_vm4 = vcmask 15360   ;;  %vm140_vm7 = vcmask 195584  }
   0x6   :  { %333 = vmatmul.mubr.msk.f32.vlgmr.msra.gmra.mxu0 %vm36_vm2, %v29_v4  ;;  %344 = vmatprep.subr.mxu0 %v379_v1  ;;  %v134_v14 = vld [vmem:[%s463_s4] sm:$0xff]  ;;  %v116_v17 = vand.u32 127, %v115_v16  ;;  %s384_s4 = smov [#allocation2]  }
   0x7   :  { %345 = vmatpush3.msk.msra.mxu0 %vm40_vm0, %v28_v0  ;;  %346 = vmatprep.mubr.msk.f32.mxu0 %vm380_vm1, %v379_v1  ;;  %v133_v22 = vld [vmem:[%s462_s3] sm:$0xff]  ;;  %s304_s14 = sshll.u32 %s384_s4, 4  ;;  %s305_s14 = int_to_ptr.vmem [resolvable:$true] %s304_s14 }
   0x8   :  { %341 = vmatprep.mubr.msk.f32.mxu1 %vm380_vm1, %v379_v1  ;;  %356 = vset.pattern.permute.xlu1 %v381_v5  ;;  %v117_v18 = vand.u32 15, %v116_v17  ;;  %s357_s3 = scalar_lea.vmem %s305_s14, 128  ;;  %p362_p1 = scmp.lt.s32.totalorder %s305_s14, %s305_s14 }
   0x9   :  { %p358_p0 = scmp.ne.s32.totalorder %s305_s14, %s357_s3  ;;  %p363_p2 = scmp.lt.s32.totalorder %s357_s3, %s357_s3 }
   0xa   :  { %347 = vmatmul.mubr.msk.f32.vlgmr.msra.gmra.mxu0 %vm122_vm3, %v215_v6  ;;  %vm131_vm5 = vcmp.ge.s32.totalorder %v117_v18, 2  ;;  %vm124_vm6 = vcmp.ge.s32.totalorder %v117_v18, 4 }
   0xb   :  { %p364_p3 = por %p363_p2, %p362_p1 }
   0xd   :  { %p365_p4 = pnand %p364_p3, %p358_p0 }
  0x7f   :  { %v34_v7 = vpop.permute.xlu0 %33 }
  0xc6   :  { %v110_v8 = vpop.f32.mrf.mxu0 }
  0xc7   :  { %v111_v9 = vadd.f32 %v110_v8, %v34_v7 }
  0xc8   :  { %v334_v10 = vpop.f32.mrf.mxu0 }
  0xc9   :  { %v114_v11 = vmax.f32 %v111_v9, 0.0 }
  0xca   :  { %v291_v12 = vpop.f32.mrf.mxu0 }
  0xcb   :  { %119 = vrot.lane.b32.xlu1 %v114_v11, %s382_s1  ;;  %126 = vrot.lane.b32.xlu0 %v114_v11, %s383_s9 }
  0xcc   :  { %336 = vmatpush3.msra.mxu1 %v114_v11  ;;  %v348_v15 = vpop.f32.mrf.mxu0 }
  0xcd   :  { %337 = vmatprep.subr.mxu1 %v379_v1 }
  0xcf   :  { %219 = vperm.xlu0 %355, %v216_v13   ;;  %137 = vperm.xlu1 %356, %v134_v14  }
 0x13d   :  { %v120_v19 = vpop.permute.xlu1 %119  ;;  %v127_v20 = vpop.permute.xlu0 %126 }
 0x13e   :  { %v130_v21 = vsel %vm129_vm4, 0.0, %v127_v20  ;;  %v123_v23 = vsel %vm122_vm3, 0.0, %v120_v19 }
 0x13f   :  { %338 = vmatpush3.msk.msra.mxu1 %vm131_vm5, %v130_v21 }
 0x140   :  { %339 = vmatprep.subr.mxu1 %v379_v1 }
 0x141   :  { %340 = vmatpush3.msk.msra.mxu1 %vm124_vm6, %v123_v23 }
 0x142   :  { %342 = vmatmul.mubr.msk.f32.vlgmr.msra.gmra.mxu1 %vm140_vm7, %v133_v22 }
 0x14a   :  { %v138_v24 = vpop.permute.xlu1 %137  ;;  %v220_v25 = vpop.permute.xlu0 %219 }
 0x14b   :  { %v292_v29 = vadd.f32 %v291_v12, %v220_v25 }
 0x202   :  { %v210_v26 = vpop.f32.mrf.mxu1 }
 0x203   :  { %v211_v27 = vadd.f32 %v210_v26, %v138_v24 }
 0x204   :  { %v343_v28 = vpop.f32.mrf.mxu1 }
 0x205   :  { %v214_v30 = vmax.f32 %v211_v27, 0.0 }
 0x207   :  { %v295_v31 = vadd.f32 %v292_v29, %v214_v30 }
 0x209   :  { %v296_v32 = vmax.f32 %v295_v31, 0.0 }
 0x20b   :  { %297 = vst [vmem:[#allocation2] sm:$0xff] %v296_v32 }
 0x20c   :  { %368 = shalt.err (!%p365_p4)
}
 0x20d   :  { %307 = dma.vmem_to_hbm [thread:$0]  %s305_s14, 128, %s466_s7, [#allocation3]  }
 0x20e   :  { %377 = dma.done.wait [#allocation3], 128  }
 0x20f   :  { %378 = vsyncadd [#allocation3], 4294967168 }
 0x210   :  { %311 = vsyncpa [#allocation3], 1 }

</bundles_post_ra>
